<compile_context>
chip_gen: v7x
topology: tpu7x:2x2x1
jax: 0.10.0
libtpu: 0.0.40
codegen_flags: <defaults>
</compile_context>

<pallas_src>
import functools
import math

import jax
import jax.numpy as jnp
from jax.experimental import pallas as pl
from jax.experimental.pallas import tpu as pltpu


LANE = 128


def _round_up(n, m):
    return ((n + m - 1) // m) * m


def _pick_time_tile(T, target):
    """Largest time-tile <= target that divides T (sublane-friendly)."""
    if T <= target:
        return T
    if T % 8 != 0:
        # TODO(synk): support ragged last tile via masked boundary blocks.
        return T
    tt = (target // 8) * 8
    while tt >= 8:
        if T % tt == 0:
            return tt
        tt -= 8
    return T


# ----------------------------------------------------------------------------
# Pallas kernel: one (TT, Cin) row tile -> (TT, O) output tile, fully fused
# ----------------------------------------------------------------------------

def _mlp_film_kernel(x_ref, g_ref, bt_ref,
                     w1_ref, w2_ref, b2_ref, w3_ref, b3_ref,
                     o_ref, *, mm_dtype):
    # x_ref:  (TT, Cin)   time tile of one batch element
    # g_ref:  (1, Hdp)    FiLM gamma for this batch element (f32)
    # bt_ref: (1, Hdp)    FiLM beta with linear1 bias folded in (f32)
    # w1: (Cin, Hdp)  w2: (Hdp, Hdp)  w3: (Hdp, O)   (mm_dtype, VMEM resident)
    # b2: (1, Hdp)  b3: (1, O)  o_ref: (TT, O)
    x = x_ref[...].astype(mm_dtype)

    # LinearFiLM (bias folded into beta): gamma * (x @ w1) + beta'
    h = jnp.dot(x, w1_ref[...], preferred_element_type=jnp.float32)
    h = g_ref[...] * h + bt_ref[...]

    # ReLU -> Linear -> ReLU -> Linear (elementwise work stays in f32)
    h = jnp.maximum(h, 0.0)
    h = jnp.dot(h.astype(mm_dtype), w2_ref[...],
                preferred_element_type=jnp.float32) + b2_ref[...]
    h = jnp.maximum(h, 0.0)
    out = jnp.dot(h.astype(mm_dtype), w3_ref[...],
                  preferred_element_type=jnp.float32) + b3_ref[...]

    o_ref[...] = out.astype(o_ref.dtype)


# ----------------------------------------------------------------------------
# Wrapper
# ----------------------------------------------------------------------------

def mlp_film(x, spkr_emb, params, *, mm_dtype=jnp.bfloat16, time_tile=1024):
    """x: [B, T, Cin], spkr_emb: [B, S] -> [B, T, out_channels]."""
    w1, b1, wf, bf, w2, b2, w3, b3 = params
    B, T, Cin = x.shape
    Hd = w1.shape[1]
    O = w3.shape[1]
    Hdp = _round_up(Hd, LANE)

    # FiLM conditioning: only B distinct rows -> compute once (tiny XLA
    # matmul), fold linear1's bias into beta so the kernel does gamma*h+beta.
    cond = spkr_emb @ wf + bf                                   # (B, 2*Hd) f32
    gamma = cond[:, :Hd]
    beta = cond[:, Hd:] + gamma * b1
    gamma = jnp.pad(gamma, ((0, 0), (0, Hdp - Hd))).reshape(B, 1, Hdp)
    beta = jnp.pad(beta, ((0, 0), (0, Hdp - Hd))).reshape(B, 1, Hdp)

    # Lane-pad the hidden dim to 128 so intermediates are full-vreg dense;
    # cast matmul operands to mm_dtype (bf16 default, f32 accumulation).
    w1p = jnp.pad(w1, ((0, 0), (0, Hdp - Hd))).astype(mm_dtype)
    w2p = jnp.pad(w2, ((0, Hdp - Hd), (0, Hdp - Hd))).astype(mm_dtype)
    b2p = jnp.pad(b2, ((0, Hdp - Hd),)).reshape(1, Hdp).astype(jnp.float32)
    w3p = jnp.pad(w3, ((0, Hdp - Hd), (0, 0))).astype(mm_dtype)
    b3r = b3.reshape(1, O).astype(jnp.float32)

    # TT<=1024 keeps 2x double-buffered (TT,Cin)+(TT,O) tiles plus resident
    # weights far below the scoped-VMEM default on v5e/v6e (128 MiB) and
    # v7x (64 MiB).
    TT = _pick_time_tile(T, time_tile)
    grid = (B, T // TT)

    kernel = functools.partial(_mlp_film_kernel, mm_dtype=mm_dtype)

    out = pl.pallas_call(
        kernel,
        out_shape=jax.ShapeDtypeStruct((B, T, O), x.dtype),
        grid=grid,
        in_specs=[
            pl.BlockSpec((None, TT, Cin), lambda b, t: (b, t, 0)),   # x tile
            pl.BlockSpec((None, 1, Hdp), lambda b, t: (b, 0, 0)),    # gamma
            pl.BlockSpec((None, 1, Hdp), lambda b, t: (b, 0, 0)),    # beta'
            pl.BlockSpec((Cin, Hdp), lambda b, t: (0, 0)),           # w1
            pl.BlockSpec((Hdp, Hdp), lambda b, t: (0, 0)),           # w2
            pl.BlockSpec((1, Hdp), lambda b, t: (0, 0)),             # b2
            pl.BlockSpec((Hdp, O), lambda b, t: (0, 0)),             # w3
            pl.BlockSpec((1, O), lambda b, t: (0, 0)),               # b3
        ],
        out_specs=pl.BlockSpec((None, TT, O), lambda b, t: (b, t, 0)),
        compiler_params=pltpu.CompilerParams(
            dimension_semantics=("parallel", "parallel")),
    )(x, gamma, beta, w1p, w2p, b2p, w3p, b3r)

    return out


# ----------------------------------------------------------------------------
# Pure-JAX reference (for correctness check)
# ----------------------------------------------------------------------------

def mlp_film_ref(x, spkr_emb, params):
    w1, b1, wf, bf, w2, b2, w3, b3 = params
    Hd = w1.shape[1]
    h = x @ w1 + b1
    cond = (spkr_emb @ wf + bf)[:, None, :]
    h = cond[..., :Hd] * h + cond[..., Hd:]
    h = jax.nn.relu(h)
    h = jax.nn.relu(h @ w2 + b2)
    return h @ w3 + b3


# ----------------------------------------------------------------------------
# Parameter construction (deterministic, PyTorch nn.Linear-style init)
# ----------------------------------------------------------------------------

def _init_linear(key, fan_in, fan_out):
    kw, kb = jax.random.split(key)
    scale = 1.0 / math.sqrt(fan_in)
    w = jax.random.uniform(kw, (fan_in, fan_out), jnp.float32, -scale, scale)
    b = jax.random.uniform(kb, (fan_out,), jnp.float32, -scale, scale)
    return w, b


def init_mlp_film_params(key, in_channels, hidden_dim, out_channels, spkr_emb_dim):
    k1, kf, k2, k3 = jax.random.split(key, 4)
    w1, b1 = _init_linear(k1, in_channels, hidden_dim)
    wf, bf = _init_linear(kf, spkr_emb_dim, 2 * hidden_dim)   # film: Linear(S, 2*Hd)
    w2, b2 = _init_linear(k2, hidden_dim, hidden_dim)
    w3, b3 = _init_linear(k3, hidden_dim, out_channels)
    return (w1, b1, wf, bf, w2, b2, w3, b3)


# ----------------------------------------------------------------------------
# Main
# ----------------------------------------------------------------------------

if __name__ == "__main__":
    B, T = 2, 16
    in_channels = 32
    hidden_dim = 64
    out_channels = 24
    spkr_emb_dim = 16

    key = jax.random.PRNGKey(0)
    kp, kx, ks = jax.random.split(key, 3)

    params = init_mlp_film_params(
        kp, in_channels, hidden_dim, out_channels, spkr_emb_dim)
    x = jax.random.normal(kx, (B, T, in_channels), jnp.float32)
    spkr_emb = jax.random.normal(ks, (B, spkr_emb_dim), jnp.float32)

    ref = mlp_film_ref(x, spkr_emb, params)

    # f32 matmul path: parity check with the pure-JAX reference.
    fwd_f32 = jax.jit(lambda a, s: mlp_film(a, s, params, mm_dtype=jnp.float32))
    out_f32 = jax.block_until_ready(fwd_f32(x, spkr_emb))
    assert out_f32.shape == (B, T, out_channels)
    err_f32 = float(jnp.max(jnp.abs(out_f32 - ref)))
    assert jnp.allclose(out_f32, ref, rtol=2e-2, atol=2e-2), err_f32

    # bf16 matmul-operand path (default, f32 accumulation): looser tolerance
    # justified by bf16 operand rounding (~2^-9 relative per operand).
    fwd_bf16 = jax.jit(lambda a, s: mlp_film(a, s, params))
    out_bf16 = jax.block_until_ready(fwd_bf16(x, spkr_emb))
    err_bf16 = float(jnp.max(jnp.abs(out_bf16 - ref)))
    assert jnp.allclose(out_bf16, ref, rtol=5e-2, atol=5e-2), err_bf16

    print("KERNEL_OK")
</pallas_src>

<mosaic_0001>
module attributes {stable_mosaic.version = 11 : i64} {
  func.func @_mlp_film_kernel(%arg0: i32, %arg1: i32, %arg2: memref<1x16x32xf32, #tpu.memory_space<vmem>>, %arg3: memref<1x1x128xf32, #tpu.memory_space<vmem>>, %arg4: memref<1x1x128xf32, #tpu.memory_space<vmem>>, %arg5: memref<32x128xf32, #tpu.memory_space<vmem>>, %arg6: memref<128x128xf32, #tpu.memory_space<vmem>>, %arg7: memref<1x128xf32, #tpu.memory_space<vmem>>, %arg8: memref<128x24xf32, #tpu.memory_space<vmem>>, %arg9: memref<1x24xf32, #tpu.memory_space<vmem>>, %arg10: memref<1x16x24xf32, #tpu.memory_space<vmem>>) attributes {dimension_semantics = [#tpu.dimension_semantics<parallel>, #tpu.dimension_semantics<parallel>], iteration_bounds = array<i64: 2, 1>, scalar_prefetch = 0 : i64, scratch_operands = 0 : i64, tpu.core_type = #tpu.core_type<tc>, window_params = [{transform_indices = @transform_0, window_bounds = array<i64: 1, 16, 32>}, {transform_indices = @transform_1, window_bounds = array<i64: 1, 1, 128>}, {transform_indices = @transform_2, window_bounds = array<i64: 1, 1, 128>}, {pipeline_mode = #tpu.pipeline_mode<synchronous>, transform_indices = @transform_3, window_bounds = array<i64: 32, 128>}, {pipeline_mode = #tpu.pipeline_mode<synchronous>, transform_indices = @transform_4, window_bounds = array<i64: 128, 128>}, {pipeline_mode = #tpu.pipeline_mode<synchronous>, transform_indices = @transform_5, window_bounds = array<i64: 1, 128>}, {pipeline_mode = #tpu.pipeline_mode<synchronous>, transform_indices = @transform_6, window_bounds = array<i64: 128, 24>}, {pipeline_mode = #tpu.pipeline_mode<synchronous>, transform_indices = @transform_7, window_bounds = array<i64: 1, 24>}, {transform_indices = @transform_8, window_bounds = array<i64: 1, 16, 24>}]} {
    %c0 = arith.constant 0 : index
    %c0_0 = arith.constant 0 : index
    %c0_1 = arith.constant 0 : index
    %0 = vector.load %arg2[%c0, %c0_0, %c0_1] : memref<1x16x32xf32, #tpu.memory_space<vmem>>, vector<1x16x32xf32>
    %1 = vector.shape_cast %0 : vector<1x16x32xf32> to vector<16x32xf32>
    %c0_2 = arith.constant 0 : index
    %c0_3 = arith.constant 0 : index
    %2 = vector.load %arg5[%c0_2, %c0_3] : memref<32x128xf32, #tpu.memory_space<vmem>>, vector<32x128xf32>
    %cst = arith.constant dense<0.000000e+00> : vector<16x128xf32>
    %3 = tpu.matmul %1, %2, %cst {dimension_numbers = #tpu.dot_dimension_numbers<[1], [0], [0], [1], [0, 0, 1, 1], [], []>} : vector<16x32xf32>, vector<32x128xf32>, vector<16x128xf32> -> vector<16x128xf32>
    %c0_4 = arith.constant 0 : index
    %c0_5 = arith.constant 0 : index
    %c0_6 = arith.constant 0 : index
    %4 = vector.load %arg3[%c0_4, %c0_5, %c0_6] : memref<1x1x128xf32, #tpu.memory_space<vmem>>, vector<1x1x128xf32>
    %5 = vector.shape_cast %4 : vector<1x1x128xf32> to vector<1x128xf32>
    %6 = vector.broadcast %5 : vector<1x128xf32> to vector<16x128xf32>
    %7 = arith.mulf %6, %3 : vector<16x128xf32>
    %c0_7 = arith.constant 0 : index
    %c0_8 = arith.constant 0 : index
    %c0_9 = arith.constant 0 : index
    %8 = vector.load %arg4[%c0_7, %c0_8, %c0_9] : memref<1x1x128xf32, #tpu.memory_space<vmem>>, vector<1x1x128xf32>
    %9 = vector.shape_cast %8 : vector<1x1x128xf32> to vector<1x128xf32>
    %10 = vector.broadcast %9 : vector<1x128xf32> to vector<16x128xf32>
    %11 = arith.addf %7, %10 : vector<16x128xf32>
    %cst_10 = arith.constant 0.000000e+00 : f32
    %12 = vector.broadcast %cst_10 : f32 to vector<16x128xf32>
    %13 = arith.maximumf %11, %12 : vector<16x128xf32>
    %c0_11 = arith.constant 0 : index
    %c0_12 = arith.constant 0 : index
    %14 = vector.load %arg6[%c0_11, %c0_12] : memref<128x128xf32, #tpu.memory_space<vmem>>, vector<128x128xf32>
    %cst_13 = arith.constant dense<0.000000e+00> : vector<16x128xf32>
    %15 = tpu.matmul %13, %14, %cst_13 {dimension_numbers = #tpu.dot_dimension_numbers<[1], [0], [0], [1], [0, 0, 1, 1], [], []>} : vector<16x128xf32>, vector<128x128xf32>, vector<16x128xf32> -> vector<16x128xf32>
    %c0_14 = arith.constant 0 : index
    %c0_15 = arith.constant 0 : index
    %16 = vector.load %arg7[%c0_14, %c0_15] : memref<1x128xf32, #tpu.memory_space<vmem>>, vector<1x128xf32>
    %17 = vector.broadcast %16 : vector<1x128xf32> to vector<16x128xf32>
    %18 = arith.addf %15, %17 : vector<16x128xf32>
    %cst_16 = arith.constant 0.000000e+00 : f32
    %19 = vector.broadcast %cst_16 : f32 to vector<16x128xf32>
    %20 = arith.maximumf %18, %19 : vector<16x128xf32>
    %c0_17 = arith.constant 0 : index
    %c0_18 = arith.constant 0 : index
    %21 = vector.load %arg8[%c0_17, %c0_18] : memref<128x24xf32, #tpu.memory_space<vmem>>, vector<128x24xf32>
    %cst_19 = arith.constant dense<0.000000e+00> : vector<16x24xf32>
    %22 = tpu.matmul %20, %21, %cst_19 {dimension_numbers = #tpu.dot_dimension_numbers<[1], [0], [0], [1], [0, 0, 1, 1], [], []>} : vector<16x128xf32>, vector<128x24xf32>, vector<16x24xf32> -> vector<16x24xf32>
    %c0_20 = arith.constant 0 : index
    %c0_21 = arith.constant 0 : index
    %23 = vector.load %arg9[%c0_20, %c0_21] : memref<1x24xf32, #tpu.memory_space<vmem>>, vector<1x24xf32>
    %24 = vector.broadcast %23 : vector<1x24xf32> to vector<16x24xf32>
    %25 = arith.addf %22, %24 : vector<16x24xf32>
    %c0_22 = arith.constant 0 : index
    %c0_23 = arith.constant 0 : index
    %c0_24 = arith.constant 0 : index
    %26 = vector.load %arg10[%c0_22, %c0_23, %c0_24] : memref<1x16x24xf32, #tpu.memory_space<vmem>>, vector<1x16x24xf32>
    %27 = vector.shape_cast %26 : vector<1x16x24xf32> to vector<16x24xf32>
    %28 = vector.shape_cast %25 : vector<16x24xf32> to vector<1x16x24xf32>
    tpu.vector_store %arg10[%c0_22, %c0_23, %c0_24], %28 {strides = array<i32>} : memref<1x16x24xf32, #tpu.memory_space<vmem>>, vector<1x16x24xf32>,
    return
  }
  func.func @transform_0(%arg0: i32, %arg1: i32) -> (i32, i32, i32) {
    %c0_i32 = arith.constant 0 : i32
    %c0_i32_0 = arith.constant 0 : i32
    return %arg0, %arg1, %c0_i32 : i32, i32, i32
  }
  func.func @transform_1(%arg0: i32, %arg1: i32) -> (i32, i32, i32) {
    %c0_i32 = arith.constant 0 : i32
    %c0_i32_0 = arith.constant 0 : i32
    %c0_i32_1 = arith.constant 0 : i32
    return %arg0, %c0_i32, %c0_i32_0 : i32, i32, i32
  }
  func.func @transform_2(%arg0: i32, %arg1: i32) -> (i32, i32, i32) {
    %c0_i32 = arith.constant 0 : i32
    %c0_i32_0 = arith.constant 0 : i32
    %c0_i32_1 = arith.constant 0 : i32
    return %arg0, %c0_i32, %c0_i32_0 : i32, i32, i32
  }
  func.func @transform_3(%arg0: i32, %arg1: i32) -> (i32, i32) {
    %c0_i32 = arith.constant 0 : i32
    %c0_i32_0 = arith.constant 0 : i32
    %c0_i32_1 = arith.constant 0 : i32
    return %c0_i32, %c0_i32_0 : i32, i32
  }
  func.func @transform_4(%arg0: i32, %arg1: i32) -> (i32, i32) {
    %c0_i32 = arith.constant 0 : i32
    %c0_i32_0 = arith.constant 0 : i32
    %c0_i32_1 = arith.constant 0 : i32
    return %c0_i32, %c0_i32_0 : i32, i32
  }
  func.func @transform_5(%arg0: i32, %arg1: i32) -> (i32, i32) {
    %c0_i32 = arith.constant 0 : i32
    %c0_i32_0 = arith.constant 0 : i32
    %c0_i32_1 = arith.constant 0 : i32
    return %c0_i32, %c0_i32_0 : i32, i32
  }
  func.func @transform_6(%arg0: i32, %arg1: i32) -> (i32, i32) {
    %c0_i32 = arith.constant 0 : i32
    %c0_i32_0 = arith.constant 0 : i32
    %c0_i32_1 = arith.constant 0 : i32
    return %c0_i32, %c0_i32_0 : i32, i32
  }
  func.func @transform_7(%arg0: i32, %arg1: i32) -> (i32, i32) {
    %c0_i32 = arith.constant 0 : i32
    %c0_i32_0 = arith.constant 0 : i32
    %c0_i32_1 = arith.constant 0 : i32
    return %c0_i32, %c0_i32_0 : i32, i32
  }
  func.func @transform_8(%arg0: i32, %arg1: i32) -> (i32, i32, i32) {
    %c0_i32 = arith.constant 0 : i32
    %c0_i32_0 = arith.constant 0 : i32
    return %arg0, %arg1, %c0_i32 : i32, i32, i32
  }
}

</mosaic_0001>

<bundles_post_ra>
// kernel: _lambda_.1
= control target key start
LH: loop header
LB: loop body
LE: loop exit
PB: predicated region body
PF: predicated region fallthrough
CT: control target
= control target key end

     0   :  { %s1626_s0 = inlined_call_operand.vmem [shape: f32[2,16,32], index: 0, kind: input, shape index: {}]   ;;  %s1627_s1 = inlined_call_operand.vmem [shape: f32[2,1,128], index: 1, kind: input, shape index: {}]   ;;  %s1628_s2 = inlined_call_operand.vmem [shape: f32[2,1,128], index: 2, kind: input, shape index: {}]   ;;  %s1629_s3 = inlined_call_operand.hbm [shape: f32[32,128], index: 3, kind: input, shape index: {}]   ;;  %s1630_s4 = inlined_call_operand.hbm [shape: f32[128,128], index: 4, kind: input, shape index: {}]   ;;  %s1631_s5 = inlined_call_operand.vmem [shape: f32[1,128], index: 5, kind: input, shape index: {}]   ;;  %s1632_s6 = inlined_call_operand.hbm [shape: f32[128,24], index: 6, kind: input, shape index: {}]   ;;  %s1633_s7 = inlined_call_operand.vmem [shape: f32[1,24], index: 7, kind: input, shape index: {}]   ;;  %s1634_s8 = inlined_call_operand.hbm [shape: f32[2,16,24], index: 8, kind: output, shape index: {}]  }
   0x1   :  { %1643 = sst [smem:[#allocation17_spill]] %s1630_s4 }
   0x2   :  { %13 = vsyncpa [#allocation3], 0 }
   0x3   :  { %14 = vsyncpa [#allocation6], 0 }
   0x4   :  { %15 = vsyncpa [#allocation4], 0 }
   0x5   :  { %17 = vsyncpa [#allocation4 + $0x1], 0  ;;  %s1397_s27 = smov 0   ;;  %s1399_s28 = smov 0  }
   0x6   :  { %s1401_s29 = smov 0   ;;  %s1403_s30 = smov 0  }
   0x7   :  { %s1405_s9 = smov 0   ;;  %s1407_s10 = smov 0  }
   0x8 LB: > { %1644 = sst [smem:[#allocation12_spill]] %s1330_s29  ;;  %s860_s11 = sadd.s32 4294967295, %s1342_s10   ;;  %s1342_s10 = sphi %s1407_s10, %s23_s10   ;;  %s1338_s9 = sphi %s1405_s9, %s1664_s9   ;;  %s1334_s30 = sphi %s1403_s30, %s1663_s30   ;;  %s1330_s29 = sphi %s1401_s29, %s1662_s29   ;;  %s1326_s28 = sphi %s1399_s28, %s1666_s28   ;;  %s1322_s27 = sphi %s1397_s27, %s1665_s27  }
   0x9   : > { %1645 = sst [smem:[#allocation13_spill]] %s1338_s9  ;;  %s861_s12 = sadd.s32 4294967294, %s1342_s10  }
   0xa   : > { %s35_s13 = sadd.s32 1, %s1338_s9  ;;  %s229_s14 = sadd.s32 1, %s1330_s29 }
   0xb   : > { %p37_p0 = scmp.ge.s32.totalorder %s35_s13, 2  ;;  %p239_p1 = scmp.ne.s32.totalorder %s1330_s29, %s1326_s28 }
   0xc   : > { %p240_p2 = scmp.eq.s32.totalorder %s860_s11, 1  ;;  %p245_p3 = scmp.ne.s32.totalorder %s1326_s28, %s1322_s27 }
   0xd   : > { %s1668_s13 = smov (%p37_p0, %s35_s13), 0  ;;  %p246_p5 = scmp.eq.s32.totalorder %s861_s12, 1 }
   0xe   : > { %1646 = sst [smem:[#allocation14_spill]] %s1668_s13  ;;  %p1437_p4 = por %p240_p2, %p239_p1 }
   0xf   : > { %s224_s16 = ssub.s32 %s1338_s9, %s1668_s13  ;;  %p862_p6 = scmp.ge.s32.totalorder %s1342_s10, 1 }
  0x10   : > { %s1647_s15 = scalar_select %p1437_p4, 1, 0 }
  0x11   : > { %p227_p7 = scmp.eq.s32.totalorder %s224_s16, 0  ;;  %p1444_p8 = por %p246_p5, %p245_p3 }
  0x12   : > { %p253_p9 = scmp.lt.s32.totalorder %s1342_s10, 3  ;;  %p1456_p11 = scmp.eq.s32.totalorder %s860_s11, 0 }
  0x13   : > { %s1648_s17 = scalar_select %p1444_p8, 1, 0 }
  0x14   : > { %s1450_s18 = scalar_select %p227_p7, %s1330_s29, %s229_s14  }
  0x15   : > { %1649 = sst [smem:[#allocation15_spill]] %s1648_s17  ;;  %p1452_p10 = pnand %p862_p6, %p253_p9 }
  0x16   : > { %1650 = sst [smem:[#allocation16_spill]] %s1450_s18  ;;  %s1344_s21 = smov [#allocation5]  }
  0x17   : > { %s1651_s19 = scalar_select %p1452_p10, 1, 0 }
  0x18   : > { %s1652_s20 = scalar_select %p1456_p11, 1, 0 }
  0x19   : > { %p1096_p12 = pneg %p1452_p10  ;;  %s278_s22 = sshll.u32 %s1344_s21, 4  ;;  %s279_s22 = int_to_ptr.vmem [resolvable:$true] %s278_s22 }
  0x1a   : > { %s1345_s24 = smov [#allocation2]   ;;  %s1654_s4 = sld [smem:[#allocation17_spill]] }
  0x1b   : > { %p1464_p13 = pnand %p1456_p11, %p1096_p12  ;;  %s265_s25 = sshll.u32 %s1345_s24, 4  ;;  %s266_s25 = int_to_ptr.vmem [resolvable:$true] %s265_s25 }
  0x1d   : > { %p1476_p1 = pneg %p1464_p13 }
  0x20   : > { %s1172_s11 = scalar_lea.hbm %s1654_s4, 2048 }
  0x21   : > { %p1173_p0 = scmp.ne.s32.totalorder %s1654_s4, %s1172_s11  ;;  %p1179_p5 = scmp.lt.u32.totalorder %s1172_s11, %s1654_s4 }
  0x23   : > { %p1175_p2 = pnand %p1476_p1, %p1173_p0 }
  0x25   : > { %p1176_p3 = pneg %p1175_p2 }
  0x27   : > { %p1181_p6 = pnand %p1179_p5, %p1176_p3 }
  0x29   : > { %1184 = shalt.err (!%p1181_p6)
}
  0x2a   : > { %s1185_s24 = scalar_lea.vmem %s279_s22, 2048  ;;  %p1193_p8 = scmp.lt.s32.totalorder %s279_s22, %s279_s22 }
  0x2b   : > { %p1186_p7 = scmp.ne.s32.totalorder %s279_s22, %s1185_s24  ;;  %p1194_p4 = scmp.lt.s32.totalorder %s1185_s24, %s1185_s24 }
  0x2d   : > { %p1188_p9 = pnand %p1186_p7, %p1476_p1  ;;  %p1195_p11 = por %p1194_p4, %p1193_p8 }
  0x2f   : > { %p1189_p12 = pneg %p1188_p9 }
  0x31   : > { %p1196_p10 = pnand %p1195_p11, %p1189_p12 }
  0x33   : > { %1199 = shalt.err (!%p1196_p10)
}
  0x34   : > { %s1346_s26 = smov 128   ;;  %s1347_s12 = smov 8  }
  0x35   : > { %1102 = dma.hbm_to_vmem [thread:$0]  (!%p1464_p13), %s1654_s4, 2048, %s279_s22, [#allocation6], %s1346_s26, %s1346_s26, %s1347_s12  }
  0x36   : > { %s1200_s16 = scalar_lea.hbm %s1629_s3, 512 }
  0x37   : > { %p1201_p4 = scmp.ne.s32.totalorder %s1629_s3, %s1200_s16  ;;  %p1207_p11 = scmp.lt.u32.totalorder %s1200_s16, %s1629_s3 }
  0x39   : > { %p1203_p8 = pnand %p1201_p4, %p1476_p1 }
  0x3b   : > { %p1204_p10 = pneg %p1203_p8 }
  0x3d   : > { %p1209_p0 = pnand %p1207_p11, %p1204_p10 }
  0x3f   : > { %1212 = shalt.err (!%p1209_p0)
}
  0x40   : > { %s1213_s9 = scalar_lea.vmem %s266_s25, 512  ;;  %p1221_p6 = scmp.lt.s32.totalorder %s266_s25, %s266_s25 }
  0x41   : > { %p1214_p2 = scmp.ne.s32.totalorder %s266_s25, %s1213_s9  ;;  %p1222_p7 = scmp.lt.s32.totalorder %s1213_s9, %s1213_s9 }
  0x43   : > { %p1216_p3 = pnand %p1214_p2, %p1476_p1  ;;  %p1223_p9 = por %p1222_p7, %p1221_p6 }
  0x45   : > { %p1217_p5 = pneg %p1216_p3 }
  0x47   : > { %p1224_p12 = pnand %p1223_p9, %p1217_p5 }
  0x49   : > { %1227 = shalt.err (!%p1224_p12)
}
  0x4a   : > { %1099 = dma.hbm_to_vmem [thread:$0]  (!%p1464_p13), %s1629_s3, 512, %s266_s25, [#allocation3], %s1346_s26, %s1346_s26, %s1347_s12  }
  0x4b   : > { %s1348_s18 = smov [#allocation7]   ;;  %s1228_s14 = scalar_lea.hbm %s1632_s6, 2048 }
  0x4c   : > { %s294_s22 = sshll.u32 %s1348_s18, 4  ;;  %p1229_p4 = scmp.ne.s32.totalorder %s1632_s6, %s1228_s14  ;;  %s295_s22 = int_to_ptr.vmem [resolvable:$true] %s294_s22 }
  0x4d   : > { %p1235_p11 = scmp.lt.u32.totalorder %s1228_s14, %s1632_s6 }
  0x4e   : > { %p1231_p8 = pnand %p1229_p4, %p1476_p1 }
  0x50   : > { %p1232_p10 = pneg %p1231_p8 }
  0x52   : > { %p1237_p0 = pnand %p1235_p11, %p1232_p10 }
  0x54   : > { %1240 = shalt.err (!%p1237_p0)
}
  0x55   : > { %s1241_s25 = scalar_lea.vmem %s295_s22, 2048  ;;  %p1249_p6 = scmp.lt.s32.totalorder %s295_s22, %s295_s22 }
  0x56   : > { %p1242_p2 = scmp.ne.s32.totalorder %s295_s22, %s1241_s25  ;;  %p1250_p7 = scmp.lt.s32.totalorder %s1241_s25, %s1241_s25 }
  0x58   : > { %p1244_p3 = pnand %p1242_p2, %p1476_p1  ;;  %p1251_p9 = por %p1250_p7, %p1249_p6 }
  0x5a   : > { %p1245_p5 = pneg %p1244_p3 }
  0x5c   : > { %p1252_p12 = pnand %p1251_p9, %p1245_p5 }
  0x5e   : > { %1255 = shalt.err (!%p1252_p12)
}
  0x5f   : > { %1105 = dma.hbm_to_vmem [thread:$0]  (!%p1464_p13), %s1632_s6, 2048, %s295_s22, [#allocation6], %s1346_s26, %s1346_s26, %s1347_s12  }
  0x60   : > { %p1656_p4 = scmp.ne.s32.totalorder %s1651_s19, 0 }
  0x61   : > { %p1657_p1 = scmp.ne.s32.totalorder (!%p1656_p4), %s1652_s20, 0 }
  0x62   : > { %338 = sbr.rel (%p1656_p4) target bundleno = 787 (0x313), region = 52 }
  0x69   : > { %1309 = dma.done.wait (%p1657_p1), [#allocation3], 512  }
  0x6a   : > { %1311 = vsyncadd (%p1657_p1), [#allocation3], 4294966784 }
  0x6b   : > { %1313 = dma.done.wait (%p1657_p1), [#allocation6], 4096  }
  0x6c   : > { %1315 = vsyncadd (%p1657_p1), [#allocation6], 4294963200  ;;  %p391_p8 = scmp.lt.s32.totalorder %s1334_s30, 1  ;;  %vm413_vm0 = vcmask 261120   ;;  %v409_v0 = vld [vmem:[#allocation2] sm:$0xff]  ;;  %v410_v1 = vld [vmem:[#allocation2 + $0x8] sm:$0xff] }
  0x6d   : > { %v411_v2 = vld [vmem:[#allocation2 + $0x10] sm:$0xff]  ;;  %v1010_v3 = vpack.c.bf16 %v410_v1, %v409_v0  ;;  %v412_v4 = vld [vmem:[#allocation2 + $0x18] sm:$0xff]  ;;  %v515_v7 = vld [vmem:[#allocation5] sm:$0xff]  ;;  %s387_s24 = sand.u32 1, %s1326_s28   ;;  %vm713_vm1 = vcmask 195584   ;;  %p1658_p10 = scmp.ne.s32.totalorder %s1647_s15, 0 }
  0x6e   : > { %s1549_s23 = scalar_select %p391_p8, %s1334_s30, 1  ;;  %v1014_v6 = vpack.c.bf16 %v412_v4, %v411_v2  ;;  %v516_v8 = vld [vmem:[#allocation5 + $0x8] sm:$0xff]  ;;  %v517_v9 = vld [vmem:[#allocation5 + $0x10] sm:$0xff]  ;;  %v518_v11 = vld [vmem:[#allocation5 + $0x18] sm:$0xff] }
  0x6f   : > { %1011 = vmatprep.subr.bf16.mxu0 %v1010_v3  ;;  %v1018_v10 = vpack.c.bf16 %v516_v8, %v515_v7  ;;  %v1022_v12 = vpack.c.bf16 %v518_v11, %v517_v9  ;;  %v519_v13 = vld [vmem:[#allocation5 + $0x20] sm:$0xff]  ;;  %v520_v14 = vld [vmem:[#allocation5 + $0x28] sm:$0xff]  ;;  %v521_v17 = vld [vmem:[#allocation5 + $0x30] sm:$0xff]  ;;  %s871_s9 = sshll.u32 %s387_s24, 4  ;;  %s1580_s20 = scalar_lea.sflag [#allocation4], %s387_s24 }
  0x70   : > { %s885_s19 = sshll.u32 %s1549_s23, 4  ;;  %1013 = vmatpush3.bf16.msra.mxu0 %v1010_v3  ;;  %v1026_v15 = vpack.c.bf16 %v520_v14, %v519_v13  ;;  %v522_v18 = vld [vmem:[#allocation5 + $0x38] sm:$0xff]  ;;  %v523_v20 = vld [vmem:[#allocation5 + $0x40] sm:$0xff]  ;;  %v524_v21 = vld [vmem:[#allocation5 + $0x48] sm:$0xff]  ;;  %s402_s18 = scalar_lea.vmem %s1627_s1, %s1549_s23 }
  0x71   : > { %s398_s12 = scalar_lea.vmem %s1626_s0, %s885_s19  ;;  %1015 = vmatprep.subr.bf16.mxu0 %v1014_v6  ;;  %1019 = vmatprep.subr.bf16.mxu1 %v1018_v10  ;;  %v1030_v19 = vpack.c.bf16 %v522_v18, %v521_v17  ;;  %v1034_v22 = vpack.c.bf16 %v524_v21, %v523_v20  ;;  %v525_v23 = vld [vmem:[#allocation5 + $0x50] sm:$0xff]  ;;  %v526_v24 = vld [vmem:[#allocation5 + $0x58] sm:$0xff]  ;;  %v527_v26 = vld [vmem:[#allocation5 + $0x60] sm:$0xff]  ;;  %s405_s11 = scalar_lea.vmem %s1628_s2, %s1549_s23 }
  0x72   : > { %v407_v5 = vld [vmem:[%s398_s12] sm:$0xff]  ;;  %1021 = vmatpush3.bf16.msra.mxu1 %v1018_v10  ;;  %v408_v16 = vld [vmem:[%s398_s12 + $0x8] sm:$0xff]  ;;  %v1038_v25 = vpack.c.bf16 %v526_v24, %v525_v23  ;;  %v529_v29 = vld [vmem:[#allocation5 + $0x70] sm:$0xff]  ;;  %s389_s29 = scalar_lea.vmem [#allocation8], %s871_s9  ;;  %s886_s19 = sshll.u32 %s1334_s30, 8 }
  0x73   : > { %937 = vmatprep.mubr.msk.f32.mxu0 %vm413_vm0, %v407_v5  ;;  %1023 = vmatprep.subr.bf16.mxu1 %v1022_v12  ;;  %v528_v27 = vld [vmem:[#allocation5 + $0x68] sm:$0xff]  ;;  %v530_v30 = vld [vmem:[#allocation5 + $0x78] sm:$0xff]  ;;  %v615_v32 = vld [vmem:[#allocation7] sm:$0xff]  ;;  %s732_s23 = sshll.u32 %s389_s29, 4  ;;  %s1578_s12 = scalar_lea.hbm %s1634_s8, %s886_s19  ;;  %s1573_s23 = int_to_ptr.vmem [resolvable:$true] %s732_s23 }
  0x74   : > { %1017 = vmatpush3.bf16.msra.mxu0 %v1014_v6  ;;  %v1042_v28 = vpack.c.bf16 %v528_v27, %v527_v26  ;;  %v1046_v31 = vpack.c.bf16 %v530_v30, %v529_v29  ;;  %v616_v33 = vld [vmem:[#allocation7 + $0x8] sm:$0xff]  ;;  %v617_v34 = vld [vmem:[#allocation7 + $0x10] sm:$0xff]  ;;  %v618_v36 = vld [vmem:[#allocation7 + $0x18] sm:$0xff]  ;;  %s1256_s30 = scalar_lea.vmem %s1573_s23, 256  ;;  %s1349_s17 = smov [#allocation8]  }
  0x75   : > { %v1050_v35 = vpack.c.bf16 %v616_v33, %v615_v32  ;;  %v1054_v37 = vpack.c.bf16 %v618_v36, %v617_v34  ;;  %v619_v38 = vld [vmem:[#allocation7 + $0x20] sm:$0xff]  ;;  %v620_v39 = vld [vmem:[#allocation7 + $0x28] sm:$0xff]  ;;  %v621_v41 = vld [vmem:[#allocation7 + $0x30] sm:$0xff]  ;;  %p1257_p13 = scmp.ne.s32.totalorder %s1573_s23, %s1256_s30 }
  0x76   : > { %1025 = vmatpush3.bf16.msra.mxu1 %v1022_v12  ;;  %v1058_v40 = vpack.c.bf16 %v620_v39, %v619_v38  ;;  %v622_v42 = vld [vmem:[#allocation7 + $0x38] sm:$0xff]  ;;  %v623_v44 = vld [vmem:[#allocation7 + $0x40] sm:$0xff]  ;;  %v624_v45 = vld [vmem:[#allocation7 + $0x48] sm:$0xff] }
  0x77   : > { %938 = vmatmul.mubr.msk.f32.vlgmr.msra.gmra.mrb[0].mxu0 %vm413_vm0, %v408_v16  ;;  %1027 = vmatprep.subr.bf16.mxu1 %v1026_v15  ;;  %v1062_v43 = vpack.c.bf16 %v622_v42, %v621_v41  ;;  %v1066_v46 = vpack.c.bf16 %v624_v45, %v623_v44  ;;  %v625_v47 = vld [vmem:[#allocation7 + $0x50] sm:$0xff]  ;;  %v626_v48 = vld [vmem:[#allocation7 + $0x58] sm:$0xff]  ;;  %v627_v50 = vld [vmem:[#allocation7 + $0x60] sm:$0xff]  ;;  %p1258_p11 = pnand %p1257_p13, %p1658_p10 }
  0x78   : > { %1051 = vmatprep.subr.bf16.mxu0 %v1050_v35  ;;  %v1070_v49 = vpack.c.bf16 %v626_v48, %v625_v47  ;;  %v628_v51 = vld [vmem:[#allocation7 + $0x68] sm:$0xff]  ;;  %v876_v53 = vld [vmem:[%s402_s18] ss:$0 sm:$0xff]  ;;  %v629_v63 = vld [vmem:[#allocation7 + $0x70] sm:$0xff]  ;;  %s1260_s18 = sshll.u32 %s1349_s17, 4  ;;  %s1261_s18 = int_to_ptr.vmem [resolvable:$false] %s1260_s18 }
  0x79   : > { %1053 = vmatpush3.bf16.msra.mxu0 %v1050_v35  ;;  %v1074_v52 = vpack.c.bf16 %v628_v51, %v627_v50  ;;  %v877_v55 = vld [vmem:[%s405_s11] ss:$0 sm:$0xff]  ;;  %v630_v0 = vld [vmem:[#allocation7 + $0x78] sm:$0xff]  ;;  %p1259_p0 = pneg %p1258_p11  ;;  %s1262_s22 = scalar_lea.vmem %s1261_s18, 512 }
  0x7a   : > { %1029 = vmatpush3.bf16.msra.mxu1 %v1026_v15  ;;  %1055 = vmatprep.subr.bf16.mxu0 %v1054_v37  ;;  %v1078_v1 = vpack.c.bf16 %v630_v0, %v629_v63  ;;  %v878_v2 = vld [vmem:[%s1631_s5] ss:$0 sm:$0xff]  ;;  %p1263_p2 = scmp.lt.s32.totalorder %s1573_s23, %s1261_s18  ;;  %p1264_p3 = scmp.lt.s32.totalorder %s1262_s22, %s1256_s30 }
  0x7b   : > { %1031 = vmatprep.subr.bf16.mxu1 %v1030_v19  ;;  %v879_v9 = vld [vmem:[%s1633_s7] ss:$0 sm:$0xff] }
  0x7c   : > { %p1265_p5 = por %p1264_p3, %p1263_p2 }
  0x7d   : > { %1057 = vmatpush3.bf16.msra.mxu0 %v1054_v37 }
  0x7e   : > { %1033 = vmatpush3.bf16.msra.mxu1 %v1030_v19  ;;  %1059 = vmatprep.subr.bf16.mxu0 %v1058_v40  ;;  %p1266_p6 = pnand %p1265_p5, %p1259_p0 }
  0x7f   : > { %1035 = vmatprep.subr.bf16.mxu1 %v1034_v22 }
  0x81   : > { %1061 = vmatpush3.bf16.msra.mxu0 %v1058_v40 }
  0x82   : > { %1037 = vmatpush3.bf16.msra.mxu1 %v1034_v22  ;;  %1063 = vmatprep.subr.bf16.mxu0 %v1062_v43 }
  0x83   : > { %1039 = vmatprep.subr.bf16.mxu1 %v1038_v25 }
  0x85   : > { %1065 = vmatpush3.bf16.msra.mxu0 %v1062_v43 }
  0x86   : > { %1041 = vmatpush3.bf16.msra.mxu1 %v1038_v25  ;;  %1067 = vmatprep.subr.bf16.mxu0 %v1066_v46 }
  0x87   : > { %1043 = vmatprep.subr.bf16.mxu1 %v1042_v28 }
  0x89   : > { %1069 = vmatpush3.bf16.msra.mxu0 %v1066_v46 }
  0x8a   : > { %1045 = vmatpush3.bf16.msra.mxu1 %v1042_v28  ;;  %1071 = vmatprep.subr.bf16.mxu0 %v1070_v49 }
  0x8b   : > { %1047 = vmatprep.subr.bf16.mxu1 %v1046_v31 }
  0x8d   : > { %1073 = vmatpush3.bf16.msra.mxu0 %v1070_v49 }
  0x8e   : > { %1049 = vmatpush3.bf16.msra.mxu1 %v1046_v31  ;;  %1075 = vmatprep.subr.bf16.mxu0 %v1074_v52 }
  0x91   : > { %1077 = vmatpush3.bf16.msra.mxu0 %v1074_v52 }
  0x92   : > { %1079 = vmatprep.subr.bf16.mxu0 %v1078_v1 }
  0x95   : > { %1081 = vmatpush3.bf16.msra.mxu0 %v1078_v1 }
 0x14a   : > { %v939_v54 = vpop.f32.mrb[0].mxu0 }
 0x14b   : > { %v503_v56 = vmul.f32 %v939_v54, %v876_v53  ;;  %v486_v57 = vpop.f32.mrb[1].mxu0 }
 0x14c   : > { %v502_v58 = vmul.f32 %v876_v53, %v486_v57 }
 0x14d   : > { %v512_v59 = vadd.f32 %v877_v55, %v503_v56 }
 0x14e   : > { %v511_v60 = vadd.f32 %v877_v55, %v502_v58 }
 0x14f   : > { %v514_v62 = vmax.f32 %v512_v59, 0.0 }
 0x150   : > { %v513_v61 = vmax.f32 %v511_v60, 0.0 }
 0x152   : > { %972 = vmatprep.mubr.f32.mxu1 %v513_v61 }
 0x153   : > { %973 = vmatmul.mubr.f32.vlgmr.msra.gmra.mrb[0].mxu1 %v514_v62 }
 0x226   : > { %v974_v3 = vpop.f32.mrb[0].mxu1 }
 0x227   : > { %v610_v4 = vadd.f32 %v974_v3, %v878_v2  ;;  %v604_v5 = vpop.f32.mrb[1].mxu1 }
 0x228   : > { %v605_v6 = vadd.f32 %v878_v2, %v604_v5 }
 0x229   : > { %v614_v8 = vmax.f32 %v610_v4, 0.0 }
 0x22a   : > { %v613_v7 = vmax.f32 %v605_v6, 0.0 }
 0x22c   : > { %1007 = vmatprep.mubr.f32.mxu0 %v613_v7 }
 0x22d   : > { %1008 = vmatmul.mubr.f32.vlgmr.msra.gmra.mrb[2].mxu0 %v614_v8 }
 0x300   : > { %v1009_v10 = vpop.f32.mrb[2].mxu0 }
 0x301   : > { %v710_v11 = vadd.f32 %v1009_v10, %v879_v9  ;;  %v704_v12 = vpop.f32.mrb[3].mxu0 }
 0x302   : > { %v705_v13 = vadd.f32 %v879_v9, %v704_v12 }
 0x303   : > { %715 = vst.msk [vmem:[%s389_s29 + $0x8] sm:$0xff] %vm713_vm1, %v710_v11 }
 0x304   : > { %714 = vst.msk [vmem:[%s389_s29] sm:$0xff] %vm713_vm1, %v705_v13 }
 0x305   : > { %1269 = shalt.err (!%p1266_p6)
}
 0x306   : > { %s1270_s13 = scalar_lea.hbm %s1578_s12, 256  ;;  %s1274_s16 = scalar_lea.hbm %s1634_s8, 512 }
 0x307   : > { %p1271_p7 = scmp.ne.s32.totalorder %s1578_s12, %s1270_s13  ;;  %p1275_p4 = scmp.lt.u32.totalorder %s1578_s12, %s1634_s8 }
 0x308   : > { %p1276_p1 = scmp.lt.u32.totalorder %s1274_s16, %s1270_s13  ;;  %p1278_p13 = scmp.lt.u32.totalorder %s1270_s13, %s1578_s12 }
 0x309   : > { %p1272_p9 = pnand %p1271_p7, %p1658_p10 }
 0x30a   : > { %p1277_p8 = por %p1276_p1, %p1275_p4 }
 0x30b   : > { %p1273_p12 = pneg %p1272_p9 }
 0x30c   : > { %p1279_p11 = por %p1278_p13, %p1277_p8 }
 0x30e   : > { %p1280_p0 = pnand %p1279_p11, %p1273_p12 }
 0x310   : > { %1283 = shalt.err (!%p1280_p0)
}
 0x311   : > { %s1350_s25 = smov 128   ;;  %s1351_s4 = smov 8  }
 0x312   : > { %1094 = dma.vmem_to_hbm [thread:$0]  (%p1658_p10), %s1573_s23, 256, %s1578_s12, %s1580_s20, %s1350_s25, %s1350_s25, %s1351_s4  }
 0x313 PF: > { %s1659_s29 = sld [smem:[#allocation15_spill]]  ;;  %p1116_p2 = scmp.ge.s32.totalorder %s1342_s10, 2 }
 0x314   : > { %s747_s19 = sand.u32 1, %s1322_s27  }
 0x315   : > { %s748_s21 = scalar_lea.sflag [#allocation4], %s747_s19 }
 0x319   : > { %p1660_p3 = scmp.ne.s32.totalorder %s1659_s29, 0 }
 0x31b   : > { %p1107_p5 = pnand %p1116_p2, %p1660_p3 }
 0x31d   : > { %1317 = dma.done.wait (!%p1107_p5), %s748_s21, 256  }
 0x31e   : > { %1319 = vsyncadd (!%p1107_p5), %s748_s21, 4294967040  ;;  %s23_s10 = sadd.s32 1, %s1342_s10   ;;  %s1661_s26 = sld [smem:[#allocation12_spill]] }
 0x31f   : > { %p20_p6 = scmp.ge.s32.totalorder %s23_s10, 4   ;;  %s1662_s29 = sld [smem:[#allocation16_spill]] }
 0x320   : > { %s1663_s30 = sld [smem:[#allocation13_spill]]  ;;  %s1664_s9 = sld [smem:[#allocation14_spill]] }
 0x321   : > { %s1665_s27 = smov %s1326_s28  ;;  %22 = sbr.rel (!%p20_p6) target bundleno = 8 (0x8), region = 106 }
 0x324   : > { %s1666_s28 = smov %s1661_s26 }
 0x328   :  { %753 = vsyncpa [#allocation3], 1 }
 0x329   :  { %755 = vsyncpa [#allocation3 + $0x1], 1 }
 0x32a   :  { %756 = vsyncpa [#allocation6], 1 }
 0x32b   :  { %757 = vsyncpa [#allocation4], 1 }
 0x32c   :  { %759 = vsyncpa [#allocation4 + $0x1], 1 }

</bundles_post_ra>
